<compile_context>
chip_gen: v5e
topology: v5e:2x2
jax: 0.10.0
libtpu: 0.0.40
codegen_flags: <defaults>
</compile_context>

<pallas_src>
import functools

import jax
import jax.numpy as jnp
from jax import lax
from jax.experimental import pallas as pl
from jax.experimental.pallas import tpu as pltpu

# L0 hyper-parameters (defaults from _L0Norm.__init__)
GAMMA = -0.1
ZETA = 1.1
BETA = 2.0 / 3.0  # temperature (unused in eval-mode mask)

# Safe scoped-VMEM limit on every generation (v5e/v6e: 128 MiB physical,
# v7x: 64 MiB physical -> keep requested limit well under it).
_VMEM_LIMIT = 48 * 1024 * 1024


def _round_up(x, m):
    return (x + m - 1) // m * m


def _pick_tile(padded, base, preferred):
    """Largest multiple of `base` that divides `padded` and is <= preferred."""
    best = base
    t = base
    cap = min(preferred, padded)
    while t <= cap:
        if padded % t == 0:
            best = t
        t += base
    return best


def _preferred_tiles():
    """(pref_m, pref_n, pref_k) per TPU generation."""
    try:
        kind = jax.devices()[0].device_kind.lower()
    except Exception:  # pragma: no cover - defensive
        kind = ""
    if "v6" in kind:
        # v6e: ridge ~656 flops/byte and 128 MiB VMEM -> push tiles to 1024
        # (double-buffered footprint ~16 MiB, comfortably within budget).
        return 1024, 1024, 1024
    # v5e / v7x: 512x512 output tiles (AI = 256 flops/byte) already exceed the
    # HBM ridge (~240 / ~311) and keep the footprint << v7x's 64 MiB VMEM.
    return 512, 512, 1024


def _pad2(a, rows, cols):
    r, c = a.shape
    if r == rows and c == cols:
        return a
    return jnp.pad(a, ((0, rows - r), (0, cols - c)))


# ---------------------------------------------------------------------------
# Two-pass path, pass 1: Wm = W * hard_sigmoid(sigmoid(loc)*(zeta-gamma)+gamma)
# ---------------------------------------------------------------------------
def _gate_kernel(w_ref, loc_ref, wm_ref):
    # Gate math in f32 (EUP sigmoid); masked weight stored bf16 for the MXU.
    s = jax.nn.sigmoid(loc_ref[...]) * (ZETA - GAMMA) + GAMMA
    mask = jnp.clip(s, 0.0, 1.0)  # hard_sigmoid
    wm_ref[...] = (w_ref[...] * mask).astype(wm_ref.dtype)


def _masked_weight(weight_p, loc_p):
    Np, Kp = weight_p.shape
    # Pure HBM-streaming elementwise pass: large tiles, decoupled from the
    # matmul tiling (128-wide tiles only reach ~29% of HBM roofline).
    gn = _pick_tile(Np, 128, 512)
    gk = _pick_tile(Kp, 128, 1024)
    return pl.pallas_call(
        _gate_kernel,
        out_shape=jax.ShapeDtypeStruct((Np, Kp), jnp.bfloat16),
        grid_spec=pltpu.PrefetchScalarGridSpec(
            num_scalar_prefetch=0,
            grid=(Np // gn, Kp // gk),
            in_specs=[
                pl.BlockSpec((gn, gk), lambda j, k: (j, k)),
                pl.BlockSpec((gn, gk), lambda j, k: (j, k)),
            ],
            out_specs=pl.BlockSpec((gn, gk), lambda j, k: (j, k)),
        ),
        compiler_params=pltpu.CompilerParams(
            dimension_semantics=("parallel", "parallel"),
            vmem_limit_bytes=_VMEM_LIMIT,
        ),
        cost_estimate=pl.CostEstimate(
            flops=4 * Np * Kp,
            transcendentals=Np * Kp,
            bytes_accessed=(4 + 4 + 2) * Np * Kp,
        ),
    )(weight_p, loc_p)


# ---------------------------------------------------------------------------
# Two-pass path, pass 2: tiled matmul  out = x @ Wm.T + b
# ---------------------------------------------------------------------------
def _matmul_kernel(x_ref, wm_ref, b_ref, out_ref):
    k = pl.program_id(2)

    @pl.when(k == 0)
    def _():
        out_ref[...] = jnp.zeros_like(out_ref)

    # (tm, tk) x (tn, tk), contracting the last dims of both -> (tm, tn).
    # Transposed-RHS matmul maps to the MXU directly (no in-kernel transpose),
    # accumulation goes straight into the resident f32 output tile.
    out_ref[...] += lax.dot_general(
        x_ref[...], wm_ref[...],
        dimension_numbers=(((1,), (1,)), ((), ())),
        preferred_element_type=jnp.float32,
    )

    @pl.when(k == pl.num_programs(2) - 1)
    def _():
        out_ref[...] += b_ref[...]


# ---------------------------------------------------------------------------
# Fused path (single M tile): gate applied in-register inside the matmul.
# ---------------------------------------------------------------------------
def _fused_kernel(x_ref, w_ref, loc_ref, b_ref, out_ref):
    k = pl.program_id(1)

    @pl.when(k == 0)
    def _():
        out_ref[...] = jnp.zeros_like(out_ref)

    # Gate math in f32; masked weight quantized to bf16 only as the MXU operand.
    s = jax.nn.sigmoid(loc_ref[...]) * (ZETA - GAMMA) + GAMMA
    wm = (w_ref[...] * jnp.clip(s, 0.0, 1.0)).astype(jnp.bfloat16)

    out_ref[...] += lax.dot_general(
        x_ref[...], wm,
        dimension_numbers=(((1,), (1,)), ((), ())),
        preferred_element_type=jnp.float32,
    )

    @pl.when(k == pl.num_programs(1) - 1)
    def _():
        out_ref[...] += b_ref[...]


# ---------------------------------------------------------------------------
# Wrapper
# ---------------------------------------------------------------------------
def l0_linear(x, weight, bias, loc, *, max_fused_m=None):
    """Eval-mode L0Linear forward.

    x: (B, in_f) f32; weight/loc: (out_f, in_f) f32; bias: (out_f,) f32.
    Returns (out, penalty) matching L0Linear.forward with self.training=False.
    `max_fused_m` (static) overrides the single-M-tile threshold for the fused
    path (None -> generation-dependent default).
    """
    B, in_f = x.shape
    out_f, _ = weight.shape

    pref_m, pref_n, pref_k = _preferred_tiles()
    if max_fused_m is None:
        max_fused_m = pref_m

    # Pad M to 16 (bf16 sublane packing), N/K to 128 only -- NOT to tile
    # multiples -- so awkward shapes never inflate work by a full tile.
    Mp = _round_up(B, 16)
    Np = _round_up(out_f, 128)
    Kp = _round_up(in_f, 128)

    tn = _pick_tile(Np, 128, pref_n)
    tk = _pick_tile(Kp, 128, pref_k)

    # Zero padding is exact: padded K columns contribute 0 to the dot, padded
    # M rows / N columns are sliced off below. pad + bf16 cast fuse into one
    # XLA op under jit; pad is skipped entirely when already aligned.
    x_bf = _pad2(x, Mp, Kp).astype(jnp.bfloat16)
    w_p = _pad2(weight, Np, Kp)
    loc_p = _pad2(loc, Np, Kp)
    b_p = bias if out_f == Np else jnp.pad(bias, (0, Np - out_f))
    b_p = b_p.reshape(1, Np).astype(jnp.float32)

    if Mp <= max_fused_m:
        # ---- Fused path: whole M in one block; skip pass 1 and the Wm HBM
        # round-trip (weight-side traffic 8 B/elem vs 12 B/elem two-pass). ----
        if Np // tn < 2 and Np >= 256:
            # Split N into >= 2 parallel tiles so both v7x TensorCores get work.
            tn = _pick_tile(Np, 128, Np // 2)
        n_tiles = Np // tn
        out_p = pl.pallas_call(
            _fused_kernel,
            out_shape=jax.ShapeDtypeStruct((Mp, Np), jnp.float32),
            grid_spec=pltpu.PrefetchScalarGridSpec(
                num_scalar_prefetch=0,
                grid=(n_tiles, Kp // tk),
                in_specs=[
                    pl.BlockSpec((Mp, tk), lambda j, k: (0, k)),
                    pl.BlockSpec((tn, tk), lambda j, k: (j, k)),
                    pl.BlockSpec((tn, tk), lambda j, k: (j, k)),
                    pl.BlockSpec((1, tn), lambda j, k: (0, j)),
                ],
                out_specs=pl.BlockSpec((Mp, tn), lambda j, k: (0, j)),
            ),
            compiler_params=pltpu.CompilerParams(
                dimension_semantics=("parallel", "arbitrary"),
                vmem_limit_bytes=_VMEM_LIMIT,
            ),
            cost_estimate=pl.CostEstimate(
                flops=2 * Mp * Np * Kp + 4 * Np * Kp,
                transcendentals=Np * Kp,
                bytes_accessed=(8 * Np * Kp + 2 * Mp * Kp * n_tiles
                                + 4 * Mp * Np + 4 * Np),
            ),
        )(x_bf, w_p, loc_p, b_p)
    else:
        # ---- Two-pass path: gate cost & bf16 Wm bytes amortized over M tiles.
        tm = _pick_tile(Mp, 16, pref_m)
        m_tiles, n_tiles = Mp // tm, Np // tn
        wm = _masked_weight(w_p, loc_p)
        out_p = pl.pallas_call(
            _matmul_kernel,
            out_shape=jax.ShapeDtypeStruct((Mp, Np), jnp.float32),
            grid_spec=pltpu.PrefetchScalarGridSpec(
                num_scalar_prefetch=0,
                grid=(m_tiles, n_tiles, Kp // tk),
                in_specs=[
                    pl.BlockSpec((tm, tk), lambda i, j, k: (i, k)),
                    pl.BlockSpec((tn, tk), lambda i, j, k: (j, k)),
                    pl.BlockSpec((1, tn), lambda i, j, k: (0, j)),
                ],
                out_specs=pl.BlockSpec((tm, tn), lambda i, j, k: (i, j)),
            ),
            compiler_params=pltpu.CompilerParams(
                dimension_semantics=("parallel", "parallel", "arbitrary"),
                vmem_limit_bytes=_VMEM_LIMIT,
            ),
            cost_estimate=pl.CostEstimate(
                flops=2 * Mp * Np * Kp,
                transcendentals=0,
                bytes_accessed=(2 * Mp * Kp * n_tiles + 2 * Np * Kp * m_tiles
                                + 4 * Mp * Np + 4 * Np),
            ),
        )(x_bf, wm, b_p)

    out = out_p[:B, :out_f]
    penalty = jnp.asarray(0.0, dtype=jnp.float32)  # eval-mode penalty
    return out, penalty


def _reference(x, weight, bias, loc):
    s = jax.nn.sigmoid(loc) * (ZETA - GAMMA) + GAMMA
    mask = jnp.clip(s, 0.0, 1.0)
    return x @ (weight * mask).T + bias[None, :]


if __name__ == "__main__":
    key = jax.random.PRNGKey(0)
    k_x, k_w, k_b, k_loc = jax.random.split(key, 4)

    batch = 8
    in_features = 32
    out_features = 16

    # Deterministic parameter init mirroring nn.Linear + _L0Norm shapes.
    bound = 1.0 / (in_features ** 0.5)
    weight = jax.random.uniform(
        k_w, (out_features, in_features), jnp.float32, -bound, bound)
    bias = jax.random.uniform(
        k_b, (out_features,), jnp.float32, -bound, bound)
    # loc ~ Normal(loc_mean=0, loc_sdev=0.01)
    loc = 0.01 * jax.random.normal(k_loc, (out_features, in_features), jnp.float32)

    x = jax.random.normal(k_x, (batch, in_features), jnp.float32)
    ref = _reference(x, weight, bias, loc)

    # Fused (single-M-tile) path -- default dispatch for small batch.
    out, penalty = jax.jit(l0_linear)(x, weight, bias, loc)
    out = jax.block_until_ready(out)
    assert out.shape == (batch, out_features)
    # bf16 MXU operands (f32 accumulation) -> loosened tolerance vs f32 reference.
    assert jnp.allclose(out, ref, atol=2e-2, rtol=2e-2), "fused path mismatch"
    assert float(penalty) == 0.0

    # Two-pass (gate + matmul) path, force-exercised at small shapes.
    out2, penalty2 = jax.jit(
        functools.partial(l0_linear, max_fused_m=0))(x, weight, bias, loc)
    out2 = jax.block_until_ready(out2)
    assert out2.shape == (batch, out_features)
    assert jnp.allclose(out2, ref, atol=2e-2, rtol=2e-2), "two-pass path mismatch"
    assert float(penalty2) == 0.0

    print("KERNEL_OK")
</pallas_src>

<mosaic_0001>
module attributes {stable_mosaic.version = 11 : i64} {
  func.func @_fused_kernel(%arg0: i32, %arg1: i32, %arg2: memref<16x128xbf16, #tpu.memory_space<vmem>>, %arg3: memref<128x128xf32, #tpu.memory_space<vmem>>, %arg4: memref<128x128xf32, #tpu.memory_space<vmem>>, %arg5: memref<1x128xf32, #tpu.memory_space<vmem>>, %arg6: memref<16x128xf32, #tpu.memory_space<vmem>>) attributes {dimension_semantics = [#tpu.dimension_semantics<parallel>, #tpu.dimension_semantics<arbitrary>], iteration_bounds = array<i64: 1, 1>, scalar_prefetch = 0 : i64, scratch_operands = 0 : i64, tpu.core_type = #tpu.core_type<tc>, window_params = [{transform_indices = @transform_0, window_bounds = array<i64: 16, 128>}, {transform_indices = @transform_1, window_bounds = array<i64: 128, 128>}, {transform_indices = @transform_2, window_bounds = array<i64: 128, 128>}, {transform_indices = @transform_3, window_bounds = array<i64: 1, 128>}, {transform_indices = @transform_4, window_bounds = array<i64: 16, 128>}]} {
    %c0_i32 = arith.constant 0 : i32
    %0 = arith.cmpi eq, %arg1, %c0_i32 : i32
    %1 = arith.extui %0 : i1 to i32
    %c0_i32_0 = arith.constant 0 : i32
    %2 = arith.cmpi ne, %1, %c0_i32_0 : i32
    scf.if %2 {
      %cst_17 = arith.constant 0.000000e+00 : f32
      %28 = vector.broadcast %cst_17 : f32 to vector<16x128xf32>
      %c0_18 = arith.constant 0 : index
      %c0_19 = arith.constant 0 : index
      %29 = vector.load %arg6[%c0_18, %c0_19] : memref<16x128xf32, #tpu.memory_space<vmem>>, vector<16x128xf32>
      tpu.vector_store %arg6[%c0_18, %c0_19], %28 {strides = array<i32>} : memref<16x128xf32, #tpu.memory_space<vmem>>, vector<16x128xf32>,
    } else {
    }
    %c0 = arith.constant 0 : index
    %c0_1 = arith.constant 0 : index
    %3 = vector.load %arg4[%c0, %c0_1] : memref<128x128xf32, #tpu.memory_space<vmem>>, vector<128x128xf32>
    %4 = arith.negf %3 : vector<128x128xf32>
    %5 = math.exp %4 : vector<128x128xf32>
    %cst = arith.constant 1.000000e+00 : f32
    %6 = vector.broadcast %cst : f32 to vector<128x128xf32>
    %7 = arith.addf %6, %5 : vector<128x128xf32>
    %8 = arith.divf %6, %7 : vector<128x128xf32>
    %cst_2 = arith.constant 1.200000e+00 : f32
    %9 = vector.broadcast %cst_2 : f32 to vector<128x128xf32>
    %10 = arith.mulf %8, %9 : vector<128x128xf32>
    %cst_3 = arith.constant -1.000000e-01 : f32
    %11 = vector.broadcast %cst_3 : f32 to vector<128x128xf32>
    %12 = arith.addf %10, %11 : vector<128x128xf32>
    %c0_4 = arith.constant 0 : index
    %c0_5 = arith.constant 0 : index
    %13 = vector.load %arg3[%c0_4, %c0_5] : memref<128x128xf32, #tpu.memory_space<vmem>>, vector<128x128xf32>
    %cst_6 = arith.constant 0.000000e+00 : f32
    %cst_7 = arith.constant 1.000000e+00 : f32
    %14 = vector.broadcast %cst_6 : f32 to vector<128x128xf32>
    %15 = arith.maximumf %14, %12 : vector<128x128xf32>
    %16 = vector.broadcast %cst_7 : f32 to vector<128x128xf32>
    %17 = arith.minimumf %16, %15 : vector<128x128xf32>
    %18 = arith.mulf %13, %17 : vector<128x128xf32>
    %19 = arith.truncf %18 : vector<128x128xf32> to vector<128x128xbf16>
    %c0_8 = arith.constant 0 : index
    %c0_9 = arith.constant 0 : index
    %20 = vector.load %arg6[%c0_8, %c0_9] : memref<16x128xf32, #tpu.memory_space<vmem>>, vector<16x128xf32>
    %c0_10 = arith.constant 0 : index
    %c0_11 = arith.constant 0 : index
    %21 = vector.load %arg2[%c0_10, %c0_11] : memref<16x128xbf16, #tpu.memory_space<vmem>>, vector<16x128xbf16>
    %cst_12 = arith.constant dense<0.000000e+00> : vector<16x128xf32>
    %22 = tpu.matmul %21, %19, %cst_12 {dimension_numbers = #tpu.dot_dimension_numbers<[1], [1], [0], [0], [0, 0, 1, 0], [], []>} : vector<16x128xbf16>, vector<128x128xbf16>, vector<16x128xf32> -> vector<16x128xf32>
    %23 = arith.addf %20, %22 : vector<16x128xf32>
    %c0_13 = arith.constant 0 : index
    %c0_14 = arith.constant 0 : index
    %24 = vector.load %arg6[%c0_13, %c0_14] : memref<16x128xf32, #tpu.memory_space<vmem>>, vector<16x128xf32>
    tpu.vector_store %arg6[%c0_13, %c0_14], %23 {strides = array<i32>} : memref<16x128xf32, #tpu.memory_space<vmem>>, vector<16x128xf32>,
    %c0_i32_15 = arith.constant 0 : i32
    %25 = arith.cmpi eq, %arg1, %c0_i32_15 : i32
    %26 = arith.extui %25 : i1 to i32
    %c0_i32_16 = arith.constant 0 : i32
    %27 = arith.cmpi ne, %26, %c0_i32_16 : i32
    scf.if %27 {
      %c0_17 = arith.constant 0 : index
      %c0_18 = arith.constant 0 : index
      %28 = vector.load %arg6[%c0_17, %c0_18] : memref<16x128xf32, #tpu.memory_space<vmem>>, vector<16x128xf32>
      %c0_19 = arith.constant 0 : index
      %c0_20 = arith.constant 0 : index
      %29 = vector.load %arg5[%c0_19, %c0_20] : memref<1x128xf32, #tpu.memory_space<vmem>>, vector<1x128xf32>
      %30 = vector.broadcast %29 : vector<1x128xf32> to vector<16x128xf32>
      %31 = arith.addf %28, %30 : vector<16x128xf32>
      %c0_21 = arith.constant 0 : index
      %c0_22 = arith.constant 0 : index
      %32 = vector.load %arg6[%c0_21, %c0_22] : memref<16x128xf32, #tpu.memory_space<vmem>>, vector<16x128xf32>
      tpu.vector_store %arg6[%c0_21, %c0_22], %31 {strides = array<i32>} : memref<16x128xf32, #tpu.memory_space<vmem>>, vector<16x128xf32>,
    } else {
    }
    return
  }
  func.func @transform_0(%arg0: i32, %arg1: i32) -> (i32, i32) {
    %c0_i32 = arith.constant 0 : i32
    %c0_i32_0 = arith.constant 0 : i32
    return %c0_i32, %arg1 : i32, i32
  }
  func.func @transform_1(%arg0: i32, %arg1: i32) -> (i32, i32) {
    %c0_i32 = arith.constant 0 : i32
    return %arg0, %arg1 : i32, i32
  }
  func.func @transform_2(%arg0: i32, %arg1: i32) -> (i32, i32) {
    %c0_i32 = arith.constant 0 : i32
    return %arg0, %arg1 : i32, i32
  }
  func.func @transform_3(%arg0: i32, %arg1: i32) -> (i32, i32) {
    %c0_i32 = arith.constant 0 : i32
    %c0_i32_0 = arith.constant 0 : i32
    return %c0_i32, %arg0 : i32, i32
  }
  func.func @transform_4(%arg0: i32, %arg1: i32) -> (i32, i32) {
    %c0_i32 = arith.constant 0 : i32
    %c0_i32_0 = arith.constant 0 : i32
    return %c0_i32, %arg0 : i32, i32
  }
}

</mosaic_0001>

<bundles_post_ra>
// kernel: l0_linear.1
= control target key start
LH: loop header
LB: loop body
LE: loop exit
PB: predicated region body
PF: predicated region fallthrough
CT: control target
= control target key end

     0   :  { %s1053_s2 = inlined_call_operand.vmem [shape: f32[128,128], index: 2, kind: input, shape index: {}]   ;;  %s1054_s3 = inlined_call_operand.vmem [shape: f32[1,128], index: 3, kind: input, shape index: {}]   ;;  %s1055_s1 = inlined_call_operand.vmem [shape: f32[128,128], index: 1, kind: input, shape index: {}]   ;;  %s1056_s0 = inlined_call_operand.vmem [shape: bf16[16,128], index: 0, kind: input, shape index: {}]   ;;  %s1057_s4 = inlined_call_operand.vmem [shape: f32[16,128], index: 4, kind: output, shape index: {}]  }
   0x1   :  { %v37_v0 = vld [vmem:[%s1053_s2 + $0x70] sm:$0xff]  ;;  %v38_v1 = vld [vmem:[%s1053_s2 + $0x78] sm:$0xff]  ;;  %v35_v4 = vld [vmem:[%s1053_s2 + $0x60] sm:$0xff] }
   0x2   :  { %v506_v2 = vmul.f32 -1.442695, %v37_v0  ;;  %v507_v3 = vmul.f32 -1.442695, %v38_v1  ;;  %v36_v5 = vld [vmem:[%s1053_s2 + $0x68] sm:$0xff]  ;;  %v33_v7 = vld [vmem:[%s1053_s2 + $0x50] sm:$0xff] }
   0x3   :  { %v504_v6 = vmul.f32 -1.442695, %v35_v4  ;;  %v34_v8 = vld [vmem:[%s1053_s2 + $0x58] sm:$0xff]  ;;  %v505_v9 = vmul.f32 -1.442695, %v36_v5  ;;  %v31_v12 = vld [vmem:[%s1053_s2 + $0x40] sm:$0xff] }
   0x4   :  { %515 = vpow2.f32 %v506_v2  ;;  %v502_v10 = vmul.f32 -1.442695, %v33_v7  ;;  %v503_v11 = vmul.f32 -1.442695, %v34_v8  ;;  %v32_v13 = vld [vmem:[%s1053_s2 + $0x48] sm:$0xff]  ;;  %v29_v16 = vld [vmem:[%s1053_s2 + $0x30] sm:$0xff] }
   0x5   :  { %517 = vpow2.f32 %v507_v3  ;;  %v500_v14 = vmul.f32 -1.442695, %v31_v12  ;;  %v501_v15 = vmul.f32 -1.442695, %v32_v13  ;;  %v498_v22 = vmul.f32 -1.442695, %v29_v16 }
   0x6   :  { %519 = vpow2.f32 %v504_v6  ;;  %v30_v25 = vld [vmem:[%s1053_s2 + $0x38] sm:$0xff] }
   0x7   :  { %521 = vpow2.f32 %v505_v9  ;;  %v651_v34 = vmul.f32 -1.442695, %v30_v25  ;;  %v390_v55 = vld [vmem:[%s1055_s1 + $0x78] sm:$0xff] }
   0x8   :  { %523 = vpow2.f32 %v502_v10 }
   0x9   :  { %525 = vpow2.f32 %v503_v11 }
   0xa   :  { %v516_v17 = vpop.eup %515  ;;  %527 = vpow2.f32 %v500_v14 }
   0xb   :  { %v518_v18 = vpop.eup %517  ;;  %v631_v19 = vadd.f32 1.0, %v516_v17  ;;  %529 = vpow2.f32 %v501_v15 }
   0xc   :  { %v520_v20 = vpop.eup %519  ;;  %v633_v21 = vadd.f32 1.0, %v518_v18 }
   0xd   :  { %v522_v23 = vpop.eup %521  ;;  %531 = vrcp.f32 %v631_v19  ;;  %v324_v24 = vand.u32 2147483648, %v631_v19  ;;  %v322_v27 = vand.u32 2147483647, %v631_v19  ;;  %v644_v31 = vadd.f32 1.0, %v520_v20 }
   0xe   :  { %v524_v26 = vpop.eup %523  ;;  %533 = vrcp.f32 %v633_v21  ;;  %v337_v29 = vand.u32 2147483647, %v633_v21  ;;  %v339_v30 = vand.u32 2147483648, %v633_v21  ;;  %v646_v32 = vadd.f32 1.0, %v522_v23 }
   0xf   :  { %v526_v28 = vpop.eup %525  ;;  %vm318_vm0 = vweird.f32 %v631_v19  ;;  %v649_v33 = vadd.f32 1.0, %v524_v26  ;;  %535 = vpow2.f32 %v498_v22  ;;  %v653_v36 = vor.u32 1.1754944e-38, %v324_v24 }
  0x10   :  { %v528_v35 = vpop.eup %527  ;;  %vm333_vm1 = vweird.f32 %v633_v21  ;;  %537 = vrcp.f32 %v644_v31  ;;  %v294_v37 = vand.u32 2147483648, %v644_v31  ;;  %vm658_vm2 = vcmp.eq.f32.partialorder %v322_v27, 8.507059e+37 }
  0x11   :  { %v530_v38 = vpop.eup %529  ;;  %v292_v40 = vand.u32 2147483647, %v644_v31  ;;  %539 = vrcp.f32 %v646_v32  ;;  %v309_v41 = vand.u32 2147483648, %v646_v32  ;;  %v665_v42 = vadd.f32 1.0, %v526_v28 }
  0x12   :  { %vm667_vm3 = vcmp.eq.f32.partialorder %v337_v29, 8.507059e+37  ;;  %v340_v45 = vor.u32 1.1754944e-38, %v339_v30  ;;  %vm288_vm4 = vweird.f32 %v644_v31  ;;  %v307_v46 = vand.u32 2147483647, %v646_v32 }
  0x13   :  { %v532_v43 = vpop.eup %531  ;;  %541 = vrcp.f32 %v649_v33  ;;  %v675_v49 = vor.u32 1.1754944e-38, %v294_v37  ;;  %vm303_vm5 = vweird.f32 %v646_v32  ;;  %vm258_vm6 = vweird.f32 %v649_v33 }
  0x14   :  { %v534_v47 = vpop.eup %533  ;;  %v314_v48 = vmul.f32 %v532_v43, %v631_v19  ;;  %vm319_vm7 = vweird.f32 %v532_v43  ;;  %v262_v51 = vand.u32 2147483647, %v649_v33  ;;  %v264_v52 = vand.u32 2147483648, %v649_v33 }
  0x15   :  { %v329_v50 = vmul.f32 %v534_v47, %v633_v21  ;;  %v682_v53 = vpop.eup %535  ;;  %vm334_vm8 = vweird.f32 %v534_v47  ;;  %vm684_vm9 = vcmp.eq.f32.partialorder %v292_v40, 8.507059e+37  ;;  %v310_v56 = vor.u32 1.1754944e-38, %v309_v41  ;;  %vm704_vm13 = vmor %vm318_vm0, %vm319_vm7 }
  0x16   :  { %v315_v54 = vsub.f32 1.0, %v314_v48  ;;  %543 = vrcp.f32 %v665_v42  ;;  %v538_v57 = vpop.eup %537  ;;  %vm689_vm10 = vcmp.eq.f32.partialorder %v307_v46, 8.507059e+37  ;;  %v277_v60 = vand.u32 2147483647, %v665_v42  ;;  %vm712_vm11 = vmor %vm333_vm1, %vm334_vm8  ;;  %v26_v48 = vld [vmem:[%s1053_s2 + $0x18] sm:$0xff] }
  0x17   :  { %v330_v58 = vsub.f32 1.0, %v329_v50  ;;  %v279_v61 = vand.u32 2147483648, %v665_v42  ;;  %v540_v62 = vpop.eup %539  ;;  %v284_v0 = vmul.f32 %v538_v57, %v644_v31  ;;  %vm697_vm12 = vcmp.eq.f32.partialorder %v262_v51, 8.507059e+37 }
  0x18   :  { %v316_v63 = vmul.f32 %v532_v43, %v315_v54  ;;  %v265_v2 = vor.u32 1.1754944e-38, %v264_v52  ;;  %vm289_vm14 = vweird.f32 %v538_v57  ;;  %v299_v6 = vmul.f32 %v540_v62, %v646_v32 }
  0x19   :  { %v542_v3 = vpop.eup %541  ;;  %v331_v5 = vmul.f32 %v534_v47, %v330_v58  ;;  %vm304_vm15 = vweird.f32 %v540_v62  ;;  %v285_v9 = vsub.f32 1.0, %v284_v0  ;;  %v280_v11 = vor.u32 1.1754944e-38, %v279_v61  ;;  %vm735_vm1 = vmor %vm288_vm4, %vm289_vm14 }
  0x1a   :  { %v317_v7 = vadd.f32 %v532_v43, %v316_v63  ;;  %v254_v10 = vmul.f32 %v542_v3, %v649_v33  ;;  %v300_v13 = vsub.f32 1.0, %v299_v6  ;;  %vm259_vm0 = vweird.f32 %v542_v3  ;;  %v388_v6 = vld [vmem:[%s1055_s1 + $0x68] sm:$0xff] }
  0x1b   :  { %v332_v12 = vadd.f32 %v534_v47, %v331_v5  ;;  %vm717_vm7 = vcmp.eq.f32.partialorder %v277_v60, 8.507059e+37  ;;  %v721_v15 = vadd.f32 1.0, %v528_v35  ;;  %v286_v18 = vmul.f32 %v538_v57, %v285_v9  ;;  %vm752_vm4 = vmor %vm258_vm6, %vm259_vm0 }
  0x1c   :  { %v544_v16 = vpop.eup %543  ;;  %v321_v17 = vsel %vm704_vm13, %v532_v43, %v317_v7  ;;  %v255_v19 = vsub.f32 1.0, %v254_v10  ;;  %v725_v20 = vadd.f32 1.0, %v530_v38  ;;  %v301_v24 = vmul.f32 %v540_v62, %v300_v13 }
  0x1d   :  { %v326_v21 = vsel %vm658_vm2, %v653_v36, %v321_v17  ;;  %v336_v22 = vsel %vm712_vm11, %v534_v47, %v332_v12  ;;  %v269_v25 = vmul.f32 %v544_v16, %v665_v42  ;;  %v287_v28 = vadd.f32 %v538_v57, %v286_v18  ;;  %vm745_vm2 = vmor %vm303_vm5, %vm304_vm15 }
  0x1e   :  { %v341_v26 = vsel %vm667_vm3, %v340_v45, %v336_v22  ;;  %v357_v27 = vmul.f32 1.2, %v326_v21  ;;  %v256_v30 = vmul.f32 %v542_v3, %v255_v19  ;;  %v302_v35 = vadd.f32 %v540_v62, %v301_v24 }
  0x1f   :  { %v358_v31 = vmul.f32 1.2, %v341_v26  ;;  %v270_v37 = vsub.f32 1.0, %v269_v25  ;;  %vm274_vm3 = vweird.f32 %v544_v16  ;;  %v291_v32 = vsel %vm735_vm1, %v538_v57, %v287_v28  ;;  %v27_v25 = vld [vmem:[%s1053_s2 + $0x20] sm:$0xff]  ;;  %v385_v26 = vld [vmem:[%s1055_s1 + $0x50] sm:$0xff] }
  0x20   :  { %v373_v38 = vadd.f32 -0.1, %v357_v27  ;;  %v257_v39 = vadd.f32 %v542_v3, %v256_v30  ;;  %545 = vrcp.f32 %v721_v15  ;;  %v296_v41 = vsel %vm684_vm9, %v675_v49, %v291_v32  ;;  %v389_v49 = vld [vmem:[%s1055_s1 + $0x70] sm:$0xff] }
  0x21   :  { %v374_v40 = vadd.f32 -0.1, %v358_v31  ;;  %v306_v33 = vsel %vm745_vm2, %v540_v62, %v302_v35  ;;  %v271_v43 = vmul.f32 %v544_v16, %v270_v37  ;;  %v355_v46 = vmul.f32 1.2, %v296_v41 }
  0x22   :  { %v405_v44 = vmax.f32 %v373_v38, 0.0  ;;  %v311_v45 = vsel %vm689_vm10, %v310_v56, %v306_v33  ;;  %v261_v47 = vsel %vm752_vm4, %v542_v3, %v257_v39  ;;  %vm1080_vm5 = vweird.f32 %v665_v42 }
  0x23   :  { %vm770_vm6 = vmor %vm1080_vm5, %vm274_vm3  ;;  %v406_v50 = vmax.f32 %v374_v40, 0.0  ;;  %v356_v51 = vmul.f32 1.2, %v311_v45  ;;  %v266_v52 = vsel %vm697_vm12, %v265_v2, %v261_v47  ;;  %v272_v54 = vadd.f32 %v544_v16, %v271_v43  ;;  %v25_v45 = vld [vmem:[%s1053_s2 + $0x10] sm:$0xff] }
  0x24   :  { %v421_v56 = vmin.f32 %v405_v44, 1.0  ;;  %v371_v42 = vadd.f32 -0.1, %v355_v46  ;;  %v353_v57 = vmul.f32 1.2, %v266_v52  ;;  %547 = vpow2.f32 %v651_v34  ;;  %v387_v34 = vld [vmem:[%s1055_s1 + $0x60] sm:$0xff] }
  0x25   :  { %v422_v58 = vmin.f32 %v406_v50, 1.0  ;;  %v372_v59 = vadd.f32 -0.1, %v356_v51  ;;  %v276_v60 = vsel %vm770_vm6, %v544_v16, %v272_v54  ;;  %vm228_vm8 = vweird.f32 %v721_v15  ;;  %v28_v44 = vld [vmem:[%s1053_s2 + $0x28] sm:$0xff] }
  0x26   :  { %v546_v61 = vpop.eup %545  ;;  %v437_v62 = vmul.f32 %v421_v56, %v389_v49  ;;  %v403_v63 = vmax.f32 %v371_v42, 0.0  ;;  %v281_v0 = vsel %vm717_vm7, %v280_v11, %v276_v60  ;;  %v369_v1 = vadd.f32 -0.1, %v353_v57 }
  0x27   :  { %v438_v2 = vmul.f32 %v422_v58, %v390_v55  ;;  %v404_v3 = vmax.f32 %v372_v59, 0.0  ;;  %v354_v4 = vmul.f32 1.2, %v281_v0  ;;  %v224_v5 = vmul.f32 %v546_v61, %v721_v15  ;;  %v23_v59 = vld [vmem:[%s1053_s2] sm:$0xff] }
  0x28   :  { %v419_v7 = vmin.f32 %v403_v63, 1.0  ;;  %v401_v8 = vmax.f32 %v369_v1, 0.0  ;;  %vm229_vm9 = vweird.f32 %v546_v61  ;;  %v232_v9 = vand.u32 2147483647, %v721_v15 }
  0x29   :  { %v446_v10 = vpack.c.bf16 %v438_v2, %v437_v62  ;;  %v420_v11 = vmin.f32 %v404_v3, 1.0  ;;  %v370_v12 = vadd.f32 -0.1, %v354_v4  ;;  %v225_v13 = vsub.f32 1.0, %v224_v5  ;;  %vm801_vm10 = vmor %vm228_vm8, %vm229_vm9 }
  0x2a   :  { %v548_v14 = vpop.eup %547  ;;  %v234_v16 = vand.u32 2147483648, %v721_v15  ;;  %549 = vrcp.f32 %v725_v20  ;;  %v435_v17 = vmul.f32 %v419_v7, %v387_v34  ;;  %v417_v22 = vmin.f32 %v401_v8, 1.0  ;;  %v386_v15 = vld [vmem:[%s1055_s1 + $0x58] sm:$0xff]  ;;  %v24_v7 = vld [vmem:[%s1053_s2 + $0x8] sm:$0xff] }
  0x2b   :  { %457 = vmatpush.bf16.xpose.msra.mxu0 %v446_v10  ;;  %v436_v18 = vmul.f32 %v420_v11, %v388_v6  ;;  %v402_v19 = vmax.f32 %v370_v12, 0.0  ;;  %v226_v21 = vmul.f32 %v546_v61, %v225_v13  ;;  %vm233_vm11 = vcmp.eq.f32.partialorder %v232_v9, 8.507059e+37 }
  0x2c   :  { %v235_v24 = vor.u32 1.1754944e-38, %v234_v16  ;;  %v812_v29 = vadd.f32 1.0, %v682_v53  ;;  %v247_v30 = vand.u32 2147483647, %v725_v20  ;;  %v249_v31 = vand.u32 2147483648, %v725_v20 }
  0x2d   :  { %v418_v27 = vmin.f32 %v402_v19, 1.0  ;;  %v227_v28 = vadd.f32 %v546_v61, %v226_v21  ;;  %v819_v35 = vadd.f32 1.0, %v548_v14  ;;  %v445_v36 = vpack.c.bf16 %v436_v18, %v435_v17 }
  0x2e   :  { %551 = vrcp.f32 %v812_v29  ;;  %v496_v38 = vmul.f32 -1.442695, %v27_v25  ;;  %v433_v53 = vmul.f32 %v417_v22, %v385_v26  ;;  %v202_v43 = vand.u32 2147483647, %v812_v29  ;;  %v383_v25 = vld [vmem:[%s1055_s1 + $0x40] sm:$0xff] }
  0x2f   :  { %v231_v37 = vsel %vm801_vm10, %v546_v61, %v227_v28  ;;  %553 = vrcp.f32 %v819_v35  ;;  %v434_v40 = vmul.f32 %v418_v27, %v386_v15  ;;  %vm243_vm12 = vweird.f32 %v725_v20 }
  0x30   :  { %v550_v32 = vpop.eup %549  ;;  %v236_v39 = vsel %vm233_vm11, %v235_v24, %v231_v37  ;;  %vm834_vm13 = vcmp.eq.f32.partialorder %v247_v30, 8.507059e+37  ;;  %v250_v47 = vor.u32 1.1754944e-38, %v249_v31  ;;  %555 = vpow2.f32 %v496_v38  ;;  %v384_v38 = vld [vmem:[%s1055_s1 + $0x48] sm:$0xff] }
  0x31   :  { %v239_v41 = vmul.f32 %v550_v32, %v725_v20  ;;  %v351_v33 = vmul.f32 1.2, %v236_v39  ;;  %vm244_vm14 = vweird.f32 %v550_v32  ;;  %vm198_vm15 = vweird.f32 %v812_v29 }
  0x32   :  { %v204_v51 = vand.u32 2147483648, %v812_v29  ;;  %v497_v52 = vmul.f32 -1.442695, %v28_v44  ;;  %v494_v54 = vmul.f32 -1.442695, %v25_v45  ;;  %v444_v56 = vpack.c.bf16 %v434_v40, %v433_v53  ;;  %vm852_vm7 = vmor %vm243_vm12, %vm244_vm14 }
  0x33   :  { %458 = vmatpush.bf16.xpose.msra.mxu0 %v445_v36  ;;  %v240_v49 = vsub.f32 1.0, %v239_v41  ;;  %v367_v50 = vadd.f32 -0.1, %v351_v33  ;;  %vm843_vm0 = vcmp.eq.f32.partialorder %v202_v43, 8.507059e+37  ;;  %v495_v58 = vmul.f32 -1.442695, %v26_v48 }
  0x34   :  { %v552_v55 = vpop.eup %551  ;;  %vm213_vm1 = vweird.f32 %v819_v35  ;;  %v217_v63 = vand.u32 2147483647, %v819_v35  ;;  %557 = vpow2.f32 %v497_v52  ;;  %v219_v3 = vand.u32 2147483648, %v819_v35 }
  0x35   :  { %v241_v42 = vmul.f32 %v550_v32, %v240_v49  ;;  %v554_v60 = vpop.eup %553  ;;  %v194_v62 = vmul.f32 %v552_v55, %v812_v29  ;;  %v399_v1 = vmax.f32 %v367_v50, 0.0  ;;  %vm199_vm2 = vweird.f32 %v552_v55 }
  0x36   :  { %v209_v2 = vmul.f32 %v554_v60, %v819_v35  ;;  %559 = vpow2.f32 %v494_v54  ;;  %v492_v20 = vmul.f32 -1.442695, %v23_v59  ;;  %v556_v5 = vpop.eup %555  ;;  %vm214_vm4 = vweird.f32 %v554_v60  ;;  %vm873_vm3 = vmor %vm198_vm15, %vm199_vm2 }
  0x37   :  { %v242_v0 = vadd.f32 %v550_v32, %v241_v42  ;;  %v195_v4 = vsub.f32 1.0, %v194_v62  ;;  %561 = vpow2.f32 %v495_v58  ;;  %v205_v10 = vor.u32 1.1754944e-38, %v204_v51  ;;  %vm884_vm6 = vmor %vm213_vm1, %vm214_vm4  ;;  %v381_v42 = vld [vmem:[%s1055_s1 + $0x30] sm:$0xff] }
  0x38   :  { %v210_v6 = vsub.f32 1.0, %v209_v2  ;;  %v868_v11 = vadd.f32 1.0, %v556_v5  ;;  %vm877_vm5 = vcmp.eq.f32.partialorder %v217_v63, 8.507059e+37  ;;  %v220_v17 = vor.u32 1.1754944e-38, %v219_v3 }
  0x39   :  { %v246_v34 = vsel %vm852_vm7, %v550_v32, %v242_v0  ;;  %v196_v9 = vmul.f32 %v552_v55, %v195_v4  ;;  %v415_v19 = vmin.f32 %v399_v1, 1.0  ;;  %v493_v23 = vmul.f32 -1.442695, %v24_v7 }
  0x3a   :  { %v251_v8 = vsel %vm834_vm13, %v250_v47, %v246_v34  ;;  %v211_v14 = vmul.f32 %v554_v60, %v210_v6  ;;  %v558_v18 = vpop.eup %557  ;;  %563 = vrcp.f32 %v868_v11  ;;  %v172_v15 = vand.u32 2147483647, %v868_v11 }
  0x3b   :  { %459 = vmatpush.bf16.xpose.msra.mxu0 %v444_v56  ;;  %v352_v12 = vmul.f32 1.2, %v251_v8  ;;  %v197_v21 = vadd.f32 %v552_v55, %v196_v9  ;;  %v892_v27 = vadd.f32 1.0, %v558_v18  ;;  %565 = vpow2.f32 %v492_v20 }
  0x3c   :  { %v212_v26 = vadd.f32 %v554_v60, %v211_v14  ;;  %v560_v28 = vpop.eup %559  ;;  %v174_v37 = vand.u32 2147483648, %v868_v11  ;;  %v431_v32 = vmul.f32 %v415_v19, %v383_v25  ;;  %vm168_vm8 = vweird.f32 %v868_v11 }
  0x3d   :  { %v368_v24 = vadd.f32 -0.1, %v352_v12  ;;  %v201_v29 = vsel %vm873_vm3, %v552_v55, %v197_v21  ;;  %v562_v30 = vpop.eup %561  ;;  %567 = vrcp.f32 %v892_v27  ;;  %vm909_vm9 = vcmp.eq.f32.partialorder %v172_v15, 8.507059e+37 }
  0x3e   :  { %v206_v35 = vsel %vm843_vm0, %v205_v10, %v201_v29  ;;  %v216_v36 = vsel %vm884_vm6, %v554_v60, %v212_v26  ;;  %569 = vpow2.f32 %v493_v23  ;;  %v913_v45 = vadd.f32 1.0, %v560_v28  ;;  %v382_v60 = vld [vmem:[%s1055_s1 + $0x38] sm:$0xff]  ;;  %v377_v10 = vld [vmem:[%s1055_s1 + $0x10] sm:$0xff] }
  0x3f   :  { %v400_v31 = vmax.f32 %v368_v24, 0.0  ;;  %v221_v53 = vsel %vm877_vm5, %v220_v17, %v216_v36  ;;  %v349_v39 = vmul.f32 1.2, %v206_v35  ;;  %v915_v46 = vadd.f32 1.0, %v562_v30 }
  0x40   :  { %v350_v41 = vmul.f32 1.2, %v221_v53  ;;  %v564_v33 = vpop.eup %563  ;;  %v175_v51 = vor.u32 1.1754944e-38, %v174_v37  ;;  %v187_v54 = vand.u32 2147483647, %v892_v27  ;;  %v189_v55 = vand.u32 2147483648, %v892_v27 }
  0x41   :  { %v416_v40 = vmin.f32 %v400_v31, 1.0  ;;  %v365_v43 = vadd.f32 -0.1, %v349_v39  ;;  %v566_v47 = vpop.eup %565  ;;  %v164_v50 = vmul.f32 %v564_v33, %v868_v11  ;;  %571 = vrcp.f32 %v913_v45  ;;  %v376_v37 = vld [vmem:[%s1055_s1 + $0x8] sm:$0xff] }
  0x42   :  { %v366_v49 = vadd.f32 -0.1, %v350_v41  ;;  %vm169_vm10 = vweird.f32 %v564_v33  ;;  %v142_v62 = vand.u32 2147483647, %v913_v45  ;;  %573 = vrcp.f32 %v915_v46 }
  0x43   :  { %v432_v48 = vmul.f32 %v416_v40, %v384_v38  ;;  %v397_v52 = vmax.f32 %v365_v43, 0.0  ;;  %v165_v58 = vsub.f32 1.0, %v164_v50  ;;  %v568_v59 = vpop.eup %567  ;;  %v929_v63 = vadd.f32 1.0, %v566_v47  ;;  %vm935_vm12 = vmor %vm168_vm8, %vm169_vm10 }
  0x44   :  { %v398_v57 = vmax.f32 %v366_v49, 0.0  ;;  %v570_v0 = vpop.eup %569  ;;  %v179_v3 = vmul.f32 %v568_v59, %v892_v27  ;;  %vm183_vm11 = vweird.f32 %v892_v27  ;;  %vm939_vm13 = vcmp.eq.f32.partialorder %v187_v54, 8.507059e+37 }
  0x45   :  { %v443_v56 = vpack.c.bf16 %v432_v48, %v431_v32  ;;  %v413_v61 = vmin.f32 %v397_v52, 1.0  ;;  %v166_v2 = vmul.f32 %v564_v33, %v165_v58  ;;  %v190_v34 = vor.u32 1.1754944e-38, %v189_v55  ;;  %v379_v52 = vld [vmem:[%s1055_s1 + $0x20] sm:$0xff] }
  0x46   :  { %v414_v1 = vmin.f32 %v398_v57, 1.0  ;;  %vm138_vm14 = vweird.f32 %v913_v45  ;;  %v180_v8 = vsub.f32 1.0, %v179_v3  ;;  %vm184_vm15 = vweird.f32 %v568_v59 }
  0x47   :  { %460 = vmatpush.bf16.xpose.msra.mxu0 %v443_v56  ;;  %v429_v4 = vmul.f32 %v413_v61, %v381_v42  ;;  %v167_v7 = vadd.f32 %v564_v33, %v166_v2  ;;  %v572_v9 = vpop.eup %571  ;;  %vm944_vm0 = vcmp.eq.f32.partialorder %v142_v62, 8.507059e+37  ;;  %v144_v11 = vand.u32 2147483648, %v913_v45  ;;  %vm959_vm7 = vmor %vm183_vm11, %vm184_vm15 }
  0x48   :  { %v430_v6 = vmul.f32 %v414_v1, %v382_v60  ;;  %v949_v12 = vadd.f32 1.0, %v570_v0  ;;  %575 = vrcp.f32 %v929_v63  ;;  %v181_v16 = vmul.f32 %v568_v59, %v180_v8  ;;  %v574_v18 = vpop.eup %573 }
  0x49   :  { %v171_v14 = vsel %vm935_vm12, %v564_v33, %v167_v7  ;;  %v134_v17 = vmul.f32 %v572_v9, %v913_v45  ;;  %vm139_vm1 = vweird.f32 %v572_v9  ;;  %vm153_vm2 = vweird.f32 %v915_v46 }
  0x4a   :  { %v442_v13 = vpack.c.bf16 %v430_v6, %v429_v4  ;;  %v176_v19 = vsel %vm909_vm9, %v175_v51, %v171_v14  ;;  %v157_v22 = vand.u32 2147483647, %v915_v46  ;;  %v182_v23 = vadd.f32 %v568_v59, %v181_v16  ;;  %vm976_vm3 = vmor %vm138_vm14, %vm139_vm1 }
  0x4b   :  { %v347_v24 = vmul.f32 1.2, %v176_v19  ;;  %v135_v25 = vsub.f32 1.0, %v134_v17  ;;  %v149_v26 = vmul.f32 %v574_v18, %v915_v46  ;;  %vm154_vm4 = vweird.f32 %v574_v18  ;;  %v378_v19 = vld [vmem:[%s1055_s1 + $0x18] sm:$0xff] }
  0x4c   :  { %v159_v28 = vand.u32 2147483648, %v915_v46  ;;  %v112_v29 = vand.u32 2147483647, %v929_v63  ;;  %577 = vrcp.f32 %v949_v12  ;;  %v186_v27 = vsel %vm959_vm7, %v568_v59, %v182_v23  ;;  %vm985_vm6 = vmor %vm153_vm2, %vm154_vm4  ;;  %v380_v59 = vld [vmem:[%s1055_s1 + $0x28] sm:$0xff] }
  0x4d   :  { %v363_v15 = vadd.f32 -0.1, %v347_v24  ;;  %v136_v30 = vmul.f32 %v572_v9, %v135_v25  ;;  %v150_v31 = vsub.f32 1.0, %v149_v26  ;;  %v191_v36 = vsel %vm939_vm13, %v190_v34, %v186_v27 }
  0x4e   :  { %v576_v35 = vpop.eup %575  ;;  %v145_v38 = vor.u32 1.1754944e-38, %v144_v11  ;;  %vm108_vm5 = vweird.f32 %v929_v63  ;;  %v114_v32 = vand.u32 2147483648, %v929_v63  ;;  %v348_v53 = vmul.f32 1.2, %v191_v36 }
  0x4f   :  { %461 = vmatpush.bf16.xpose.msra.mxu0 %v442_v13  ;;  %v395_v39 = vmax.f32 %v363_v15, 0.0  ;;  %v137_v40 = vadd.f32 %v572_v9, %v136_v30  ;;  %v151_v41 = vmul.f32 %v574_v18, %v150_v31  ;;  %vm989_vm8 = vcmp.eq.f32.partialorder %v157_v22, 8.507059e+37 }
  0x50   :  { %v160_v44 = vor.u32 1.1754944e-38, %v159_v28  ;;  %v104_v45 = vmul.f32 %v576_v35, %v929_v63  ;;  %vm994_vm9 = vcmp.eq.f32.partialorder %v112_v29, 8.507059e+37  ;;  %v364_v48 = vadd.f32 -0.1, %v348_v53 }
  0x51   :  { %v411_v49 = vmin.f32 %v395_v39, 1.0  ;;  %v141_v46 = vsel %vm976_vm3, %v572_v9, %v137_v40  ;;  %v152_v50 = vadd.f32 %v574_v18, %v151_v41  ;;  %vm109_vm10 = vweird.f32 %v576_v35  ;;  %v512_v40 = vld [vmem:[%s1056_s0] sm:$0xff] }
  0x52   :  { %v578_v51 = vpop.eup %577  ;;  %v146_v54 = vsel %vm944_vm0, %v145_v38, %v141_v46  ;;  %v105_v55 = vsub.f32 1.0, %v104_v45  ;;  %v115_v56 = vor.u32 1.1754944e-38, %v114_v32  ;;  %v396_v42 = vmax.f32 %v364_v48, 0.0  ;;  %vm1018_vm12 = vmor %vm108_vm5, %vm109_vm10  ;;  %v514_v41 = vld [vmem:[%s1054_s3] ss:$0 sm:$0xff] }
  0x53   :  { %v156_v57 = vsel %vm985_vm6, %v574_v18, %v152_v50  ;;  %v345_v58 = vmul.f32 1.2, %v146_v54  ;;  %vm123_vm11 = vweird.f32 %v949_v12  ;;  %v119_v62 = vmul.f32 %v578_v51, %v949_v12 }
  0x54   :  { %v161_v60 = vsel %vm989_vm8, %v160_v44, %v156_v57  ;;  %v106_v61 = vmul.f32 %v576_v35, %v105_v55  ;;  %v129_v0 = vand.u32 2147483648, %v949_v12  ;;  %v412_v1 = vmin.f32 %v396_v42, 1.0 }
  0x55   :  { %v427_v2 = vmul.f32 %v411_v49, %v379_v52  ;;  %v346_v3 = vmul.f32 1.2, %v161_v60  ;;  %v361_v4 = vadd.f32 -0.1, %v345_v58  ;;  %v120_v34 = vsub.f32 1.0, %v119_v62 }
  0x56   :  { %v107_v5 = vadd.f32 %v576_v35, %v106_v61  ;;  %vm124_vm13 = vweird.f32 %v578_v51  ;;  %v127_v6 = vand.u32 2147483647, %v949_v12  ;;  %v428_v7 = vmul.f32 %v412_v1, %v380_v59 }
  0x57   :  { %v362_v8 = vadd.f32 -0.1, %v346_v3  ;;  %v393_v9 = vmax.f32 %v361_v4, 0.0  ;;  %v121_v63 = vmul.f32 %v578_v51, %v120_v34  ;;  %v130_v13 = vor.u32 1.1754944e-38, %v129_v0  ;;  %vm125_vm14 = vmor %vm123_vm11, %vm124_vm13 }
  0x58   :  { %v111_v11 = vsel %vm1018_vm12, %v576_v35, %v107_v5  ;;  %v441_v14 = vpack.c.bf16 %v428_v7, %v427_v2  ;;  %vm128_vm15 = vcmp.eq.f32.partialorder %v127_v6, 8.507059e+37  ;;  %v375_v35 = vld [vmem:[%s1055_s1] sm:$0xff] }
  0x59   :  { %v394_v16 = vmax.f32 %v362_v8, 0.0  ;;  %v409_v17 = vmin.f32 %v393_v9, 1.0  ;;  %v116_v18 = vsel %vm994_vm9, %v115_v56, %v111_v11  ;;  %v122_v21 = vadd.f32 %v578_v51, %v121_v63 }
  0x5a   :  { %v343_v22 = vmul.f32 1.2, %v116_v18  ;;  %462 = vmatpush.bf16.xpose.msra.mxu0 %v441_v14 }
  0x5b   :  { %v410_v23 = vmin.f32 %v394_v16, 1.0  ;;  %v425_v24 = vmul.f32 %v409_v17, %v377_v10  ;;  %v126_v25 = vsel %vm125_vm14, %v578_v51, %v122_v21 }
  0x5c   :  { %v359_v26 = vadd.f32 -0.1, %v343_v22  ;;  %v131_v29 = vsel %vm128_vm15, %v130_v13, %v126_v25 }
  0x5d   :  { %v426_v28 = vmul.f32 %v410_v23, %v378_v19  ;;  %v344_v27 = vmul.f32 1.2, %v131_v29 }
  0x5e   :  { %v391_v15 = vmax.f32 %v359_v26, 0.0 }
  0x5f   :  { %v440_v30 = vpack.c.bf16 %v426_v28, %v425_v24  ;;  %v360_v31 = vadd.f32 -0.1, %v344_v27 }
  0x60   :  { %v407_v12 = vmin.f32 %v391_v15, 1.0 }
  0x61   :  { %v392_v36 = vmax.f32 %v360_v31, 0.0 }
  0x62   :  { %463 = vmatpush.bf16.xpose.msra.mxu0 %v440_v30  ;;  %v423_v32 = vmul.f32 %v407_v12, %v375_v35 }
  0x63   :  { %v408_v38 = vmin.f32 %v392_v36, 1.0 }
  0x65   :  { %v424_v53 = vmul.f32 %v408_v38, %v376_v37 }
  0x67   :  { %v439_v39 = vpack.c.bf16 %v424_v53, %v423_v32 }
  0x6a   :  { %464 = vmatpush.bf16.xpose.msra.mxu0 %v439_v39 }
  0x71   :  { %465 = vmatmul.bf16.vlgmr.msra.gmra.mxu0 %v512_v40 }
  0xee   :  { %v466_v33 = vpop.f32.mrf.mxu0 }
  0xef   :  { %v484_v43 = vadd.f32 %v514_v41, %v466_v33 }
  0xf1   :  { %486 = vst [vmem:[%s1057_s4] sm:$0xff] %v484_v43 }
  0xf6   :  { %v468_v44 = vpop.f32.mrf.mxu0 }
  0xf7   :  { %v485_v45 = vadd.f32 %v514_v41, %v468_v44 }
  0xf9   :  { %487 = vst [vmem:[%s1057_s4 + $0x8] sm:$0xff] %v485_v45 }

</bundles_post_ra>
